<compile_context>
chip_gen: v7x
topology: tpu7x:2x2x1
jax: 0.10.0
libtpu: 0.0.40
codegen_flags: <defaults>
</compile_context>

<pallas_src>
import jax
import jax.numpy as jnp
from jax.experimental import pallas as pl
from jax.experimental.pallas import tpu as pltpu


def nnue_kernel(x_ref, w_ref, bias_ref, ow_ref, o_ref):
    # Fused (board ++ extra) contraction on the MXU, f32 accumulation.
    acc = jnp.dot(x_ref[...], w_ref[...],
                  preferred_element_type=jnp.float32)              # (TB, H)
    hidden = jnp.maximum(acc + bias_ref[...], 0.0)                  # bias + ReLU
    # fc_out (N=1) as a broadcast multiply + lane reduction instead of a
    # second MXU pass; fc_out.bias is added on the host.
    o_ref[...] = jnp.sum(hidden * ow_ref[...], axis=-1, keepdims=True)


def nnue_forward(x, emb_w, hidden_bias, extra_w, extra_b, out_w, out_b,
                 tile_b=512):
    """x: (B, 771) float32.  Returns (B, 1) float32."""
    B, K = x.shape
    H = emb_w.shape[1]

    # ---- host-side parameter fusion ----
    # One (771, H) weight = [embeddings.weight ; extra_fc.weight.T],
    # one (1, H) bias = hidden_bias + extra_fc.bias,
    # fc_out.weight as a lane-dense (1, H) row; fc_out.bias added post-kernel.
    w_full = jnp.concatenate([emb_w, extra_w.T], axis=0)           # (771, H)
    bias   = (hidden_bias + extra_b).reshape(1, H).astype(jnp.float32)
    ow_row = out_w.reshape(1, H).astype(jnp.float32)

    # bf16 MXU operands (board features are 0/1 -> lossless), f32 accumulate.
    x_bf16 = x.astype(jnp.bfloat16)
    w_bf16 = w_full.astype(jnp.bfloat16)

    # ---- batch tiling ----
    # Tile must be a multiple of 8 sublanes; pad B up to a tile multiple.
    tile_b = int(min(tile_b, max(8, -(-B // 8) * 8)))
    tile_b = max(8, (tile_b // 8) * 8)
    B_pad = -(-B // tile_b) * tile_b
    if B_pad != B:
        x_bf16 = jnp.pad(x_bf16, ((0, B_pad - B), (0, 0)))
    grid = (B_pad // tile_b,)

    flops = 2 * B_pad * K * H + 4 * B_pad * H
    bytes_accessed = (x_bf16.size * 2 + w_bf16.size * 2
                      + bias.size * 4 + ow_row.size * 4 + B_pad * 4)

    out = pl.pallas_call(
        nnue_kernel,
        out_shape=jax.ShapeDtypeStruct((B_pad, 1), jnp.float32),
        grid_spec=pltpu.PrefetchScalarGridSpec(
            num_scalar_prefetch=0,
            grid=grid,
            in_specs=[
                pl.BlockSpec((tile_b, K), lambda i: (i, 0)),  # x: tiled over B
                pl.BlockSpec((K, H), lambda i: (0, 0)),       # fused weight (resident)
                pl.BlockSpec((1, H), lambda i: (0, 0)),       # fused bias (resident)
                pl.BlockSpec((1, H), lambda i: (0, 0)),       # fc_out row (resident)
            ],
            out_specs=pl.BlockSpec((tile_b, 1), lambda i: (i, 0)),
        ),
        compiler_params=pltpu.CompilerParams(
            dimension_semantics=("parallel",),
            vmem_limit_bytes=32 * 1024 * 1024),
        cost_estimate=pl.CostEstimate(
            flops=flops, transcendentals=0, bytes_accessed=bytes_accessed),
    )(x_bf16, w_bf16, bias, ow_row)

    # Fold fc_out.bias and strip batch padding on the host.
    return out[:B] + out_b.reshape(1, 1)

    # TODO(synk): if the caller can expose active-feature indices (classic NNUE
    # sparsity, ~30 active rows), switch to a scalar-prefetch gather of
    # embedding rows instead of the dense (B,768) 0/1 matmul.


def reference_forward(x, emb_w, hidden_bias, extra_w, extra_b, out_w, out_b):
    board = x[:, :768]
    extra = x[:, 768:]
    acc = board @ emb_w + hidden_bias
    et = extra @ extra_w.T + extra_b
    hidden = jnp.maximum(acc + et, 0.0)
    return hidden @ out_w.T + out_b


if __name__ == "__main__":
    B = 64         # batch (small for the self-test)
    H = 128        # hidden_size (model default is 1024)

    key = jax.random.PRNGKey(0)
    kx, kb, kemb, kew, keb, kow, kob = jax.random.split(key, 7)

    # Synthetic input: sparse-ish 0/1 board features + 3 extra features.
    board_dense = jax.random.uniform(kx, (B, 768), dtype=jnp.float32)
    board_feats = (board_dense > 0.96).astype(jnp.float32)
    extra_feats = jax.random.normal(kb, (B, 3), dtype=jnp.float32)
    x = jnp.concatenate([board_feats, extra_feats], axis=1)          # (B, 771)

    # Parameter init (shapes match the PyTorch module).
    emb_w       = jax.random.normal(kemb, (768, H), dtype=jnp.float32) * 0.02
    hidden_bias = jnp.zeros((H,), dtype=jnp.float32)
    extra_w     = jax.random.normal(kew, (H, 3), dtype=jnp.float32) * (1.0 / 3.0)
    extra_b     = jax.random.normal(keb, (H,), dtype=jnp.float32) * 0.1
    out_w       = jax.random.normal(kow, (1, H), dtype=jnp.float32) * (1.0 / H) ** 0.5
    out_b       = jax.random.normal(kob, (1,), dtype=jnp.float32) * 0.1

    # Small tile to exercise multi-step batch pipelining (grid=(4,)).
    out = nnue_forward(x, emb_w, hidden_bias, extra_w, extra_b, out_w, out_b,
                       tile_b=16)
    out = jax.block_until_ready(out)

    ref = reference_forward(x, emb_w, hidden_bias, extra_w, extra_b, out_w, out_b)
    assert out.shape == (B, 1)
    # bf16 MXU inputs with f32 accumulation -> relaxed tolerance vs f32 reference.
    assert jnp.allclose(out, ref, atol=2e-2, rtol=2e-2), (out, ref)

    print("KERNEL_OK")
</pallas_src>

<mosaic_0001>
module attributes {stable_mosaic.version = 11 : i64} {
  func.func @nnue_kernel(%arg0: i32, %arg1: memref<16x771xbf16, #tpu.memory_space<vmem>>, %arg2: memref<771x128xbf16, #tpu.memory_space<vmem>>, %arg3: memref<1x128xf32, #tpu.memory_space<vmem>>, %arg4: memref<1x128xf32, #tpu.memory_space<vmem>>, %arg5: memref<16x1xf32, #tpu.memory_space<vmem>>) attributes {dimension_semantics = [#tpu.dimension_semantics<parallel>], iteration_bounds = array<i64: 4>, scalar_prefetch = 0 : i64, scratch_operands = 0 : i64, tpu.core_type = #tpu.core_type<tc>, window_params = [{transform_indices = @transform_0, window_bounds = array<i64: 16, 771>}, {pipeline_mode = #tpu.pipeline_mode<synchronous>, transform_indices = @transform_1, window_bounds = array<i64: 771, 128>}, {pipeline_mode = #tpu.pipeline_mode<synchronous>, transform_indices = @transform_2, window_bounds = array<i64: 1, 128>}, {pipeline_mode = #tpu.pipeline_mode<synchronous>, transform_indices = @transform_3, window_bounds = array<i64: 1, 128>}, {transform_indices = @transform_4, window_bounds = array<i64: 16, 1>}]} {
    %c0 = arith.constant 0 : index
    %c0_0 = arith.constant 0 : index
    %0 = vector.load %arg1[%c0, %c0_0] : memref<16x771xbf16, #tpu.memory_space<vmem>>, vector<16x771xbf16>
    %c0_1 = arith.constant 0 : index
    %c0_2 = arith.constant 0 : index
    %1 = vector.load %arg2[%c0_1, %c0_2] : memref<771x128xbf16, #tpu.memory_space<vmem>>, vector<771x128xbf16>
    %cst = arith.constant dense<0.000000e+00> : vector<16x128xf32>
    %2 = tpu.matmul %0, %1, %cst {dimension_numbers = #tpu.dot_dimension_numbers<[1], [0], [0], [1], [0, 0, 1, 1], [], []>} : vector<16x771xbf16>, vector<771x128xbf16>, vector<16x128xf32> -> vector<16x128xf32>
    %c0_3 = arith.constant 0 : index
    %c0_4 = arith.constant 0 : index
    %3 = vector.load %arg3[%c0_3, %c0_4] : memref<1x128xf32, #tpu.memory_space<vmem>>, vector<1x128xf32>
    %4 = vector.broadcast %3 : vector<1x128xf32> to vector<16x128xf32>
    %5 = arith.addf %2, %4 : vector<16x128xf32>
    %cst_5 = arith.constant 0.000000e+00 : f32
    %6 = vector.broadcast %cst_5 : f32 to vector<16x128xf32>
    %7 = arith.maximumf %5, %6 : vector<16x128xf32>
    %c0_6 = arith.constant 0 : index
    %c0_7 = arith.constant 0 : index
    %8 = vector.load %arg4[%c0_6, %c0_7] : memref<1x128xf32, #tpu.memory_space<vmem>>, vector<1x128xf32>
    %9 = vector.broadcast %8 : vector<1x128xf32> to vector<16x128xf32>
    %10 = arith.mulf %7, %9 : vector<16x128xf32>
    %cst_8 = arith.constant dense<0.000000e+00> : vector<16xf32>
    %11 = vector.multi_reduction <add>, %10, %cst_8 [1] : vector<16x128xf32> to vector<16xf32>
    %12 = vector.shape_cast %11 : vector<16xf32> to vector<16x1xf32>
    %c0_9 = arith.constant 0 : index
    %c0_10 = arith.constant 0 : index
    %13 = vector.load %arg5[%c0_9, %c0_10] : memref<16x1xf32, #tpu.memory_space<vmem>>, vector<16x1xf32>
    tpu.vector_store %arg5[%c0_9, %c0_10], %12 {strides = array<i32>} : memref<16x1xf32, #tpu.memory_space<vmem>>, vector<16x1xf32>,
    return
  }
  func.func @transform_0(%arg0: i32) -> (i32, i32) {
    %c0_i32 = arith.constant 0 : i32
    %c0_i32_0 = arith.constant 0 : i32
    return %arg0, %c0_i32 : i32, i32
  }
  func.func @transform_1(%arg0: i32) -> (i32, i32) {
    %c0_i32 = arith.constant 0 : i32
    %c0_i32_0 = arith.constant 0 : i32
    %c0_i32_1 = arith.constant 0 : i32
    return %c0_i32, %c0_i32_0 : i32, i32
  }
  func.func @transform_2(%arg0: i32) -> (i32, i32) {
    %c0_i32 = arith.constant 0 : i32
    %c0_i32_0 = arith.constant 0 : i32
    %c0_i32_1 = arith.constant 0 : i32
    return %c0_i32, %c0_i32_0 : i32, i32
  }
  func.func @transform_3(%arg0: i32) -> (i32, i32) {
    %c0_i32 = arith.constant 0 : i32
    %c0_i32_0 = arith.constant 0 : i32
    %c0_i32_1 = arith.constant 0 : i32
    return %c0_i32, %c0_i32_0 : i32, i32
  }
  func.func @transform_4(%arg0: i32) -> (i32, i32) {
    %c0_i32 = arith.constant 0 : i32
    %c0_i32_0 = arith.constant 0 : i32
    return %arg0, %c0_i32 : i32, i32
  }
}

</mosaic_0001>

<bundles_post_ra>
// kernel: tpu_custom_call.1
= control target key start
LH: loop header
LB: loop body
LE: loop exit
PB: predicated region body
PF: predicated region fallthrough
CT: control target
= control target key end

     0   :  { %9 = vsyncpa [#allocation3], 0  ;;  %s1503_s0 = inlined_call_operand.hbm [shape: bf16[64,771], index: 0, kind: input, shape index: {}]   ;;  %s1504_s1 = inlined_call_operand.hbm [shape: bf16[771,128], index: 1, kind: input, shape index: {}]   ;;  %s1505_s2 = inlined_call_operand.vmem [shape: f32[1,128], index: 2, kind: input, shape index: {}]   ;;  %s1506_s3 = inlined_call_operand.vmem [shape: f32[1,128], index: 3, kind: input, shape index: {}]   ;;  %s1507_s4 = inlined_call_operand.vmem [shape: f32[64,1], index: 4, kind: output, shape index: {}]  }
   0x1   :  { %11 = vsyncpa [#allocation3 + $0x1], 0 }
   0x2   :  { %12 = vsyncpa [#allocation5], 0  ;;  %s1343_s15 = smov 0   ;;  %s1345_s16 = smov 0  }
   0x3   :  { %s1347_s17 = smov 0   ;;  %s1349_s18 = smov 0  }
   0x4 LB: > { %s945_s19 = sadd.s32 4294967295, %s1307_s18   ;;  %p38_p0 = scmp.ne.s32.totalorder %s1299_s16, %s1295_s15  ;;  %s1307_s18 = sphi %s1349_s18, %s1524_s18   ;;  %s1303_s17 = sphi %s1347_s17, %s1523_s17   ;;  %s1299_s16 = sphi %s1345_s16, %s1522_s16   ;;  %s1295_s15 = sphi %s1343_s15, %s1521_s15  }
   0x5   : > { %p1365_p1 = scmp.eq.s32.totalorder %s945_s19, 0  ;;  %p947_p2 = scmp.ge.s32.totalorder %s1307_s18, 1 }
   0x6   : > { %p138_p3 = scmp.lt.s32.totalorder %s1307_s18, 5  ;;  %s1309_s23 = smov [#allocation4]  }
   0x7   : > { %s1512_s20 = scalar_select %p1365_p1, 1, 0 }
   0x8   : > { %p1373_p4 = por %p1365_p1, %p38_p0  ;;  %p1377_p5 = pnand %p947_p2, %p138_p3 }
   0x9   : > { %s150_s24 = sshll.u32 %s1309_s23, 4  ;;  %s1390_s26 = sadd.s32 1, %s1307_s18   ;;  %s151_s24 = int_to_ptr.vmem [resolvable:$true] %s150_s24 }
   0xa   : > { %s1513_s21 = scalar_select %p1373_p4, 1, 0 }
   0xb   : > { %s1514_s22 = scalar_select %p1377_p5, 1, 0 }
   0xc   : > { %p1101_p6 = pneg %p1377_p5  ;;  %s25_s27 = sadd.s32 1, %s1303_s17 }
   0xd   : > { %s22_s28 = ssub.s32 %s1307_s18, %s1390_s26  ;;  %s1211_s5 = scalar_lea.hbm %s1504_s1, 6208 }
   0xe   : > { %p1385_p7 = pnand %p1101_p6, %p1365_p1  ;;  %p1212_p8 = scmp.ne.s32.totalorder %s1504_s1, %s1211_s5 }
   0xf   : > { %p1218_p12 = scmp.lt.u32.totalorder %s1211_s5, %s1504_s1 }
  0x10   : > { %p1213_p9 = pneg %p1385_p7 }
  0x12   : > { %p1214_p10 = pnand %p1213_p9, %p1212_p8 }
  0x14   : > { %p1215_p11 = pneg %p1214_p10 }
  0x16   : > { %p1220_p13 = pnand %p1218_p12, %p1215_p11 }
  0x18   : > { %1223 = shalt.err (!%p1220_p13)
}
  0x19   : > { %s1224_s10 = scalar_lea.vmem %s151_s24, 6208  ;;  %p1232_p6 = scmp.lt.s32.totalorder %s151_s24, %s151_s24 }
  0x1a   : > { %p1225_p0 = scmp.ne.s32.totalorder %s151_s24, %s1224_s10  ;;  %p1233_p1 = scmp.lt.s32.totalorder %s1224_s10, %s1224_s10 }
  0x1c   : > { %p1227_p2 = pnand %p1225_p0, %p1213_p9  ;;  %p1234_p4 = por %p1233_p1, %p1232_p6 }
  0x1e   : > { %p1228_p3 = pneg %p1227_p2 }
  0x20   : > { %p1235_p5 = pnand %p1234_p4, %p1228_p3 }
  0x22   : > { %1238 = shalt.err (!%p1235_p5)
}
  0x23   : > { %s1310_s11 = smov 64   ;;  %s1311_s12 = smov 4  }
  0x24   : > { %1104 = dma.hbm_to_vmem [thread:$0]  (!%p1385_p7), %s1504_s1, 6208, %s151_s24, [#allocation5], %s1310_s11, %s1310_s11, %s1311_s12  }
  0x25   : > { %p23_p8 = scmp.eq.s32.totalorder %s22_s28, 0  ;;  %p32_p9 = scmp.ne.s32.totalorder %s1303_s17, %s1299_s16 }
  0x26   : > { %p33_p1 = scmp.eq.s32.totalorder %s1307_s18, 0  ;;  %p1110_p4 = scmp.lt.s32.totalorder %s1307_s18, 4 }
  0x27   : > { %s1416_s15 = scalar_select %p23_p8, %s1303_s17, %s25_s27  }
  0x28   : > { %p34_p5 = por %p33_p1, %p32_p9  ;;  %s170_s23 = sand.u32 1, %s1303_s17  }
  0x29   : > { %s1092_s29 = smul.u32 56, %s170_s23  ;;  %s1431_s7 = scalar_lea.sflag [#allocation3], %s170_s23 }
  0x2a   : > { %s1093_s30 = smul.u32 896, %s1307_s18  ;;  %p1420_p10 = pnand %p1110_p4, %p34_p5 }
  0x2b   : > { %s174_s27 = scalar_lea.vmem [#allocation2], %s1092_s29  ;;  %s1244_s11 = scalar_lea.hbm %s1503_s0, 3584 }
  0x2c   : > { %s1427_s24 = scalar_lea.hbm %s1503_s0, %s1093_s30  ;;  %s182_s28 = sshll.u32 %s174_s27, 4  ;;  %s1429_s28 = int_to_ptr.vmem [resolvable:$true] %s182_s28 }
  0x2d   : > { %s1239_s8 = scalar_lea.hbm %s1427_s24, 896  ;;  %p1241_p11 = pneg %p1420_p10 }
  0x2e   : > { %p1240_p7 = scmp.ne.s32.totalorder %s1427_s24, %s1239_s8  ;;  %p1245_p0 = scmp.lt.u32.totalorder %s1427_s24, %s1503_s0 }
  0x2f   : > { %p1246_p2 = scmp.lt.u32.totalorder %s1244_s11, %s1239_s8  ;;  %p1248_p6 = scmp.lt.u32.totalorder %s1239_s8, %s1427_s24 }
  0x30   : > { %p1242_p12 = pnand %p1241_p11, %p1240_p7 }
  0x31   : > { %p1247_p3 = por %p1246_p2, %p1245_p0 }
  0x32   : > { %p1243_p13 = pneg %p1242_p12 }
  0x33   : > { %p1249_p8 = por %p1248_p6, %p1247_p3 }
  0x35   : > { %p1250_p9 = pnand %p1249_p8, %p1243_p13 }
  0x37   : > { %1253 = shalt.err (!%p1250_p9)
}
  0x38   : > { %s1254_s14 = scalar_lea.vmem %s1429_s28, 896  ;;  %s1312_s23 = smov [#allocation2]  }
  0x39   : > { %p1255_p1 = scmp.ne.s32.totalorder %s1429_s28, %s1254_s14  ;;  %s1259_s29 = sshll.u32 %s1312_s23, 4  ;;  %s1260_s29 = int_to_ptr.vmem [resolvable:$false] %s1259_s29 }
  0x3a   : > { %s1261_s30 = scalar_lea.vmem %s1260_s29, 1792  ;;  %p1262_p7 = scmp.lt.s32.totalorder %s1429_s28, %s1260_s29 }
  0x3b   : > { %p1257_p4 = pnand %p1255_p1, %p1241_p11  ;;  %p1263_p12 = scmp.lt.s32.totalorder %s1261_s30, %s1254_s14 }
  0x3d   : > { %p1258_p5 = pneg %p1257_p4  ;;  %p1264_p0 = por %p1263_p12, %p1262_p7 }
  0x3f   : > { %p1265_p2 = pnand %p1264_p0, %p1258_p5 }
  0x41   : > { %1268 = shalt.err (!%p1265_p2)
}
  0x42   : > { %s1313_s6 = smov 448   ;;  %s1314_s25 = smov 28  }
  0x43   : > { %1108 = dma.hbm_to_vmem [thread:$0]  (!%p1420_p10), %s1427_s24, 896, %s1429_s28, %s1431_s7, %s1313_s6, %s1313_s6, %s1314_s25  }
  0x44   : > { %p1517_p11 = scmp.ne.s32.totalorder %s1514_s22, 0 }
  0x45   : > { %s196_s27 = sand.u32 (!%p1517_p11), 1, %s1299_s16   ;;  %p1518_p13 = scmp.ne.s32.totalorder (!%p1517_p11), %s1513_s21, 0 }
  0x46   : > { %194 = sbr.rel (%p1517_p11) target bundleno = 516 (0x204), region = 36  ;;  %s197_s9 = scalar_lea.sflag (!%p1517_p11), [#allocation3], %s196_s27 }
  0x47   : > { %s1094_s8 = smul.u32 (!%p1517_p11), 56, %s196_s27 }
  0x49   : > { %s1462_s10 = scalar_lea.vmem (!%p1517_p11), [#allocation2], %s1094_s8 }
  0x4d   : > { %1286 = dma.done.wait (%p1518_p13), %s197_s9, 896  }
  0x4e   : > { %1288 = vsyncadd (%p1518_p13), %s197_s9, 4294966400  ;;  %p1519_p3 = scmp.ne.s32.totalorder %s1512_s20, 0 }
  0x50   : > { %1290 = dma.done.wait (%p1519_p3), [#allocation5], 6208  }
  0x51   : > { %1292 = vsyncadd (%p1519_p3), [#allocation5], 4294961088  ;;  %v1152_v0 = vld [vmem:[#allocation4 + $0x40] sm:$0xff]   ;;  %v1156_v4 = vld [vmem:[#allocation4 + $0x48] sm:$0xff]   ;;  %v1315_v38 = vmov 0.0   ;;  %vm1316_vm0 = vmmov 0  }
  0x52   : > { %v1153_v1 = vld [vmem:[#allocation4] sm:$0xff]   ;;  %1018 = vmatprep.subr.bf16.mxu0 %v1152_v0  ;;  %v1157_v5 = vld [vmem:[#allocation4 + $0x8] sm:$0xff]   ;;  %v1160_v8 = vld [vmem:[#allocation4 + $0x50] sm:$0xff]   ;;  %vm679_vm1 = vcmask 1040384   ;;  %vm680_vm2 = vcmask 1041408   ;;  %v1317_v46 = vmov 65535  }
  0x53   : > { %v1154_v2 = vld [vmem:[#allocation4 + $0xc0] sm:$0xff]   ;;  %1019 = vmatpush3.bf16.msra.mxu0 %v1153_v1  ;;  %v1158_v6 = vld [vmem:[#allocation4 + $0xc8] sm:$0xff]   ;;  %v1161_v9 = vld [vmem:[#allocation4 + $0x10] sm:$0xff]   ;;  %v681_v47 = vsel %vm679_vm1, 4294967295, %v1317_v46  ;;  %vm675_vm3 = vcmask 23552   ;;  %s955_s24 = sshll.u32 %s945_s19, 1 }
  0x54   : > { %v1155_v3 = vld [vmem:[#allocation4 + $0x80] sm:$0xff]   ;;  %1040 = vmatprep.subr.bf16.mxu1 %v1154_v2  ;;  %1020 = vmatprep.subr.bf16.mxu0 %v1156_v4  ;;  %v1159_v7 = vld [vmem:[#allocation4 + $0x88] sm:$0xff]   ;;  %v1162_v10 = vld [vmem:[#allocation4 + $0xd0] sm:$0xff]   ;;  %v682_v50 = vsel %vm680_vm2, %v681_v47, 0  ;;  %p231_p10 = scmp.lt.s32.totalorder %s955_s24, 7  ;;  %vm865_vm4 = vcmask 7168  }
  0x55   : > { %1041 = vmatpush3.bf16.msra.mxu1 %v1155_v3  ;;  %v1163_v11 = vld [vmem:[#allocation4 + $0x90] sm:$0xff]   ;;  %v1164_v12 = vld [vmem:[#allocation4 + $0x58] sm:$0xff]   ;;  %v1168_v16 = vld [vmem:[#allocation4 + $0x60] sm:$0xff]  }
  0x56   : > { %1042 = vmatprep.subr.bf16.mxu1 %v1158_v6  ;;  %v1165_v13 = vld [vmem:[#allocation4 + $0x18] sm:$0xff]   ;;  %v1169_v17 = vld [vmem:[#allocation4 + $0x20] sm:$0xff]   ;;  %v1172_v20 = vld [vmem:[#allocation4 + $0x68] sm:$0xff]   ;;  %s1526_s24 = smov (!%p231_p10, %s955_s24), 7 }
  0x57   : > { %1021 = vmatpush3.bf16.msra.mxu0 %v1157_v5  ;;  %v1166_v14 = vld [vmem:[#allocation4 + $0xd8] sm:$0xff]   ;;  %v1170_v18 = vld [vmem:[#allocation4 + $0xe0] sm:$0xff]   ;;  %v1173_v21 = vld [vmem:[#allocation4 + $0x28] sm:$0xff]   ;;  %s956_s28 = sshll.u32 %s1526_s24, 3 }
  0x58   : > { %1022 = vmatprep.subr.bf16.mxu0 %v1160_v8  ;;  %v1167_v15 = vld [vmem:[#allocation4 + $0x98] sm:$0xff]   ;;  %v1171_v19 = vld [vmem:[#allocation4 + $0xa0] sm:$0xff]   ;;  %v1174_v22 = vld [vmem:[#allocation4 + $0xe8] sm:$0xff]   ;;  %s234_s12 = scalar_lea.vmem %s1507_s4, %s956_s28 }
  0x59   : > { %1043 = vmatpush3.bf16.msra.mxu1 %v1159_v7  ;;  %v1175_v23 = vld [vmem:[#allocation4 + $0xa8] sm:$0xff]   ;;  %v1176_v24 = vld [vmem:[#allocation4 + $0x70] sm:$0xff]   ;;  %v1180_v28 = vld [vmem:[#allocation4 + $0x78] sm:$0xff]  }
  0x5a   : > { %1044 = vmatprep.subr.bf16.mxu1 %v1162_v10  ;;  %v1177_v25 = vld [vmem:[#allocation4 + $0x30] sm:$0xff]   ;;  %v1181_v29 = vld [vmem:[#allocation4 + $0x38] sm:$0xff]   ;;  %v1187_v34 = vld [vmem:[#allocation4 + $0x140] sm:$0xff]  }
  0x5b   : > { %1023 = vmatpush3.bf16.msra.mxu0 %v1161_v9  ;;  %v1178_v26 = vld [vmem:[#allocation4 + $0xf0] sm:$0xff]   ;;  %v1182_v30 = vld [vmem:[#allocation4 + $0xf8] sm:$0xff]   ;;  %v1191_v37 = vld [vmem:[#allocation4 + $0x100] sm:$0xff]  }
  0x5c   : > { %1024 = vmatprep.subr.bf16.mxu0 %v1164_v12  ;;  %v1179_v27 = vld [vmem:[#allocation4 + $0xb0] sm:$0xff]   ;;  %v1186_v33 = vld [vmem:[#allocation4 + $0xb8] sm:$0xff]   ;;  %v1192_v39 = vld [vmem:[#allocation4 + $0x148] sm:$0xff]  }
  0x5d   : > { %1045 = vmatpush3.bf16.msra.mxu1 %v1163_v11  ;;  %v1183_v31 = vld [vmem:[%s1462_s10] ss:$28 sps:$4 sm:$0xff]   ;;  %v1188_v35 = vld [vmem:[%s1462_s10 + $0x8] ss:$28 sps:$4 sm:$0xff]   ;;  %v1209_v52 = vld [vmem:[%s1462_s10 + $0x14] ss:$28 sps:$4 sm:$0xff]  }
  0x5e   : > { %1046 = vmatprep.subr.bf16.mxu1 %v1166_v14  ;;  %v1185_v32 = vld [vmem:[%s1462_s10 + $0x4] ss:$28 sps:$4 sm:$0xff]   ;;  %v1190_v36 = vld [vmem:[%s1462_s10 + $0xc] ss:$28 sps:$4 sm:$0xff]   ;;  %v1198_v45 = vld [vmem:[#allocation4 + $0x160] sm:$0xff]  }
  0x5f   : > { %1025 = vmatpush3.bf16.msra.mxu0 %v1165_v13  ;;  %718 = vmatprep.mubr.bf16.mxu0 %v1185_v32  ;;  %v1193_v40 = vld [vmem:[#allocation4 + $0x108] sm:$0xff]   ;;  %v1194_v41 = vld [vmem:[#allocation4 + $0x150] sm:$0xff]   ;;  %v1196_v43 = vld [vmem:[#allocation4 + $0x158] sm:$0xff]  }
  0x60   : > { %1026 = vmatprep.subr.bf16.mxu0 %v1168_v16  ;;  %759 = vmatprep.mubr.bf16.mxu1 %v1190_v36  ;;  %v1195_v42 = vld [vmem:[#allocation4 + $0x110] sm:$0xff]   ;;  %v1197_v44 = vld [vmem:[#allocation4 + $0x118] sm:$0xff]   ;;  %v1199_v48 = vld [vmem:[#allocation4 + $0x120] sm:$0xff]  }
  0x61   : > { %1047 = vmatpush3.bf16.msra.mxu1 %v1167_v15  ;;  %v1200_v49 = vld [vmem:[#allocation4 + $0x168] sm:$0xff]   ;;  %v1206_v51 = vld [vmem:[#allocation4 + $0x180] ss:$0 sps:$4 sm:$0x33]   ;;  %v1202_v56 = vld [vmem:[#allocation4 + $0x170] sm:$0xff]  }
  0x62   : > { %1048 = vmatprep.subr.bf16.mxu1 %v1170_v18  ;;  %v684_v53 = vand.u32 %v1206_v51, %v682_v50  ;;  %v1201_v54 = vld [vmem:[#allocation4 + $0x128] sm:$0xff]   ;;  %v1203_v57 = vld [vmem:[#allocation4 + $0x130] sm:$0xff]   ;;  %v1204_v58 = vld [vmem:[#allocation4 + $0x178] sm:$0xff]  }
  0x63   : > { %1027 = vmatpush3.bf16.msra.mxu0 %v1169_v17  ;;  %v1210_v55 = vld [vmem:[%s1462_s10 + $0x18] ss:$28 sps:$4 sm:$0xff]   ;;  %v1207_v60 = vld [vmem:[%s1462_s10 + $0x10] ss:$28 sps:$4 sm:$0xff]   ;;  %v957_v62 = vld [vmem:[%s1505_s2] ss:$0 sm:$0xff] }
  0x64   : > { %1028 = vmatprep.subr.bf16.mxu0 %v1172_v20  ;;  %v1205_v59 = vld [vmem:[#allocation4 + $0x138] sm:$0xff]  }
  0x65   : > { %1049 = vmatpush3.bf16.msra.mxu1 %v1171_v19 }
  0x66   : > { %1050 = vmatprep.subr.bf16.mxu1 %v1174_v22 }
  0x67   : > { %1029 = vmatpush3.bf16.msra.mxu0 %v1173_v21 }
  0x68   : > { %1030 = vmatprep.subr.bf16.mxu0 %v1176_v24 }
  0x69   : > { %1051 = vmatpush3.bf16.msra.mxu1 %v1175_v23 }
  0x6a   : > { %1052 = vmatprep.subr.bf16.mxu1 %v1178_v26 }
  0x6b   : > { %1031 = vmatpush3.bf16.msra.mxu0 %v1177_v25 }
  0x6c   : > { %1032 = vmatprep.subr.bf16.mxu0 %v1180_v28 }
  0x6d   : > { %1053 = vmatpush3.bf16.msra.mxu1 %v1179_v27  ;;  %v1015_v27 = vld [vmem:[%s1506_s3] ss:$0 sm:$0xff] }
  0x6e   : > { %1054 = vmatprep.subr.bf16.mxu1 %v1182_v30 }
  0x6f   : > { %1033 = vmatpush3.bf16.msra.mxu0 %v1181_v29 }
  0x70   : > { %1062 = vmatprep.subr.bf16.mxu0 %v1187_v34 }
  0x71   : > { %1055 = vmatpush3.bf16.msra.mxu1 %v1186_v33 }
  0x72   : > { %719 = vmatmul.mubr.bf16.vlgmr.msra.gmra.mrb[0].mxu0 %v1183_v31  ;;  %1086 = vmatprep.subr.bf16.mxu1 %v1315_v38 }
  0x73   : > { %1063 = vmatpush3.bf16.msra.mxu0 %v1191_v37  ;;  %800 = vmatprep.mubr.bf16.mxu0 %v1209_v52 }
  0x74   : > { %760 = vmatmul.mubr.bf16.vlgmr.msra.gmra.mrb[0].mxu1 %v1188_v35  ;;  %1064 = vmatprep.subr.bf16.mxu0 %v1192_v39 }
  0x75   : > { %1088 = vmatprep.mubr.msk.bf16.mxu1 %vm1316_vm0, %v1315_v38  ;;  %1087 = vmatpush3.bf16.msra.mxu1 %v684_v53 }
  0x77   : > { %1065 = vmatpush3.bf16.msra.mxu0 %v1193_v40 }
  0x78   : > { %1066 = vmatprep.subr.bf16.mxu0 %v1194_v41 }
  0x7b   : > { %1067 = vmatpush3.bf16.msra.mxu0 %v1195_v42 }
  0x7c   : > { %1068 = vmatprep.subr.bf16.mxu0 %v1196_v43  ;;  %1089 = vmatmul.mubr.msk.bf16.vlgmr.msra.gmra.mrb[4].mxu1 %vm675_vm3, %v1210_v55 }
  0x7f   : > { %1069 = vmatpush3.bf16.msra.mxu0 %v1197_v44 }
  0x80   : > { %1070 = vmatprep.subr.bf16.mxu0 %v1198_v45 }
  0x83   : > { %1071 = vmatpush3.bf16.msra.mxu0 %v1199_v48 }
  0x84   : > { %1072 = vmatprep.subr.bf16.mxu0 %v1200_v49 }
  0x87   : > { %1073 = vmatpush3.bf16.msra.mxu0 %v1201_v54 }
  0x88   : > { %1074 = vmatprep.subr.bf16.mxu0 %v1202_v56 }
  0x8b   : > { %1075 = vmatpush3.bf16.msra.mxu0 %v1203_v57 }
  0x8c   : > { %1076 = vmatprep.subr.bf16.mxu0 %v1204_v58 }
  0x8f   : > { %1077 = vmatpush3.bf16.msra.mxu0 %v1205_v59 }
  0x92   : > { %801 = vmatmul.mubr.bf16.vlgmr.msra.gmra.mrb[4].mxu0 %v1207_v60 }
 0x145   : > { %v1034_v61 = vpop.f32.mrb[0].mxu0 }
 0x146   : > { %v1035_v63 = vpop.f32.mrb[1].mxu0 }
 0x147   : > { %v1036_v0 = vadd.f32 %v1035_v63, %v1034_v61  ;;  %v1037_v1 = vpop.f32.mrb[2].mxu0  ;;  %v1056_v2 = vpop.f32.mrb[0].mxu1 }
 0x148   : > { %v1038_v3 = vpop.f32.mrb[3].mxu0  ;;  %v1057_v6 = vpop.f32.mrb[1].mxu1 }
 0x149   : > { %v721_v4 = vadd.f32 %v1036_v0, %v957_v62  ;;  %v1039_v5 = vadd.f32 %v1038_v3, %v1037_v1  ;;  %v1058_v7 = vadd.f32 %v1057_v6, %v1056_v2  ;;  %v1059_v8 = vpop.f32.mrb[2].mxu1 }
 0x14a   : > { %v1060_v10 = vpop.f32.mrb[3].mxu1 }
 0x14b   : > { %v724_v9 = vadd.f32 %v1039_v5, %v957_v62  ;;  %v762_v11 = vadd.f32 %v1058_v7, %v721_v4  ;;  %v1061_v12 = vadd.f32 %v1060_v10, %v1059_v8 }
 0x14d   : > { %v765_v13 = vadd.f32 %v1061_v12, %v724_v9 }
 0x14f   : > { %v843_v14 = vpop.f32.mrb[4].mxu1 }
 0x150   : > { %v1090_v15 = vpop.f32.mrb[5].mxu1 }
 0x151   : > { %v846_v16 = vpop.f32.mrb[6].mxu1 }
 0x152   : > { %v1091_v17 = vpop.f32.mrb[7].mxu1 }
 0x165   : > { %v1078_v18 = vpop.f32.mrb[4].mxu0 }
 0x166   : > { %v1079_v19 = vpop.f32.mrb[5].mxu0 }
 0x167   : > { %v1080_v20 = vadd.f32 %v1079_v19, %v1078_v18  ;;  %v1081_v21 = vpop.f32.mrb[6].mxu0 }
 0x168   : > { %v1082_v22 = vpop.f32.mrb[7].mxu0 }
 0x169   : > { %v803_v23 = vadd.f32 %v1080_v20, %v762_v11  ;;  %v1083_v24 = vadd.f32 %v1082_v22, %v1081_v21 }
 0x16b   : > { %v844_v25 = vadd.f32 %v843_v14, %v803_v23  ;;  %v806_v26 = vadd.f32 %v1083_v24, %v765_v13 }
 0x16d   : > { %v850_v28 = vmax.f32 %v844_v25, 0.0  ;;  %v847_v29 = vadd.f32 %v846_v16, %v806_v26 }
 0x16f   : > { %v851_v30 = vmax.f32 %v847_v29, 0.0  ;;  %v859_v31 = vmul.f32 %v1015_v27, %v850_v28 }
 0x171   : > { %861 = vadd.xlane.f32.xlu0 %v859_v31  ;;  %v860_v32 = vmul.f32 %v1015_v27, %v851_v30 }
 0x175   : > { %863 = vadd.xlane.f32.xlu0 %v860_v32 }
 0x1fe   : > { %v862_v33 = vpop.xlane.xlu0 %861 }
 0x1ff   : > { %866 = vst.msk [vmem:[%s234_s12] sm:$0xff] %vm865_vm4, %v862_v33 }
 0x202   : > { %v864_v34 = vpop.xlane.xlu0 %863 }
 0x203   : > { %867 = vst.msk [vmem:[%s234_s12 + $0x8] sm:$0xff] %vm865_vm4, %v864_v34 }
 0x204 PF: > { %s1520_s13 = smov %s1416_s15  ;;  %p15_p6 = scmp.ge.s32.totalorder %s1390_s26, 6  }
 0x205   : > { %s1521_s15 = smov %s1299_s16  ;;  %s1522_s16 = smov %s1303_s17 }
 0x206   : > { %s1523_s17 = smov %s1520_s13  ;;  %s1524_s18 = smov %s1390_s26 }
 0x207   :  { %17 = sbr.rel (!%p15_p6) target bundleno = 4 (0x4), region = 80 }
 0x20e   :  { %890 = vsyncpa [#allocation3], 1 }
 0x20f   :  { %892 = vsyncpa [#allocation3 + $0x1], 1 }
 0x210   :  { %893 = vsyncpa [#allocation5], 1 }

</bundles_post_ra>
